<compile_context>
chip_gen: v5e
topology: v5e:2x2
jax: 0.10.0
libtpu: 0.0.40
codegen_flags: <defaults>
</compile_context>

<pallas_src>
import jax
import jax.numpy as jnp
from jax.experimental import pallas as pl
from jax.experimental.pallas import tpu as pltpu


def _basic_block1d_kernel(x_ref, mask_ref, w1_ref, w2_ref, bn_ref, out_ref):
    # x_ref    : (M, C)   bf16  channels-last activations, per-batch zero pad rows
    # mask_ref : (M, 1)   f32   1.0 on data rows, 0.0 on per-batch pad rows
    # w1_ref   : (C, 3C)  bf16  conv1 taps [W_{-1} | W_0 | W_{+1}] along lanes
    # w2_ref   : (C, 3C)  bf16  conv2 taps
    # bn_ref   : (8, C)   f32   rows 0..3 = bn1 scale, bn1 shift, bn2 scale, bn2 shift
    # out_ref  : (M, C)   bf16
    m_rows, cp = x_ref.shape
    s1 = bn_ref[0:1, :]
    b1 = bn_ref[1:2, :]
    s2 = bn_ref[2:3, :]
    b2 = bn_ref[3:4, :]

    def conv3(lhs_bf16, w_ref):
        # One wide MXU matmul (N = 3C) against the tap-stacked weights; the
        # +/-1 row shifts are applied to the f32 output slices on the XLU and
        # summed on the VPU (no im2col LHS build, no bf16 recast pass).
        p = jnp.dot(lhs_bf16, w_ref[...], preferred_element_type=jnp.float32)
        return (pltpu.roll(p[:, 0:cp], shift=1, axis=0)               # x[m-1] @ W_{-1}
                + p[:, cp:2 * cp]                                     # x[m]   @ W_0
                + pltpu.roll(p[:, 2 * cp:3 * cp],                     # x[m+1] @ W_{+1}
                             shift=m_rows - 1, axis=0))

    # conv1 -> folded BN1 -> ReLU; zero the per-batch pad rows so conv2 sees
    # proper zero padding (mask precomputed once in the wrapper).
    h = conv3(x_ref[...], w1_ref)
    h = jnp.maximum(h * s1 + b1, 0.0) * mask_ref[...]

    # conv2 -> folded BN2 -> +identity -> ReLU.
    o = conv3(h.astype(jnp.bfloat16), w2_ref)
    o = o * s2 + b2 + x_ref[...].astype(jnp.float32)
    out_ref[...] = jnp.maximum(o, 0.0).astype(out_ref.dtype)


def basic_block1d(x_ncl, w1, bn1, w2, bn2, eps=1e-5, target_tile_rows=4096):
    """Eval-mode BasicBlock1D forward. x_ncl: (N, C, L) f32 -> (N, C, L) f32."""
    N, C_in, L = x_ncl.shape
    C_mid = w1.shape[0]
    assert C_in == C_mid, "identity shortcut requires in_planes == planes"
    assert w1.shape == (C_mid, C_in, 3) and w2.shape == (C_mid, C_mid, 3)

    lane = 128
    cp = -(-C_mid // lane) * lane                  # lane-dense channel count
    rpb = -(-(L + 2) // 16) * 16                   # rows per batch elem, multiple of 16
    # Invariant required by the roll/zero-pad scheme: >=1 leading and >=1
    # trailing zero row per batch element.
    assert rpb >= L + 2

    # ---- tile sizing from a per-step VMEM footprint estimate ----
    # bf16 in/out double buffers + two (M,3C) f32 matmul outputs + f32
    # shift/sum/identity temporaries.
    bytes_per_row = (2 * cp * 2) * 2 + (3 * cp * 4) * 2 + 6 * cp * 4
    weight_bytes = 2 * (cp * 3 * cp * 2) + 8 * cp * 4
    vmem_budget = 40 << 20                         # conservative: fits v7x's 64 MiB VMEM
    max_rows = max(rpb, (vmem_budget - weight_bytes) // bytes_per_row)
    rows = min(target_tile_rows, max_rows)

    bt = max(1, rows // rpb)                       # whole batch elements per grid step
    if N >= 2:
        bt = min(bt, -(-N // 2))                   # >=2 tiles so both v7x TCs get work
    num_tiles = -(-N // bt)
    n_pad = num_tiles * bt
    m_tile = bt * rpb
    m_total = n_pad * rpb

    vmem_limit = int(min(max(weight_bytes + m_tile * bytes_per_row + (4 << 20),
                             32 << 20), 64 << 20))

    # ---- activations: NCL -> channels-last, pad rows/channels, flatten batch ----
    x_nlc = jnp.transpose(x_ncl, (0, 2, 1))                               # (N, L, C)
    x_pad = jnp.pad(x_nlc, ((0, n_pad - N), (1, rpb - 1 - L), (0, cp - C_in)))
    x_flat = x_pad.reshape(m_total, cp).astype(jnp.bfloat16)

    # data-row mask (identical layout for every tile; constant index_map)
    pos = jnp.arange(m_tile, dtype=jnp.int32) % rpb
    mask = ((pos >= 1) & (pos <= L)).astype(jnp.float32).reshape(m_tile, 1)

    # ---- weights: (C_out, C_in, 3) -> (cp, 3*cp) = [W_{-1} | W_0 | W_{+1}] ----
    def prep_w(w):
        co, ci, _ = w.shape
        wt = jnp.transpose(w, (2, 1, 0))                                  # (3, Cin, Cout)
        wt = jnp.pad(wt, ((0, 0), (0, cp - ci), (0, cp - co)))
        return jnp.transpose(wt, (1, 0, 2)).reshape(cp, 3 * cp).astype(jnp.bfloat16)

    w1_wide, w2_wide = prep_w(w1), prep_w(w2)

    # ---- fold BatchNorm running stats; pack both layers into one (8, cp) block ----
    def fold_bn(bn):
        gamma, beta, mean, var = bn
        scale = gamma / jnp.sqrt(var + eps)
        shift = beta - mean * scale
        return (jnp.pad(scale, (0, cp - scale.shape[0])),
                jnp.pad(shift, (0, cp - shift.shape[0])))

    s1, b1 = fold_bn(bn1)
    s2, b2 = fold_bn(bn2)
    bn_packed = jnp.pad(jnp.stack([s1, b1, s2, b2]).astype(jnp.float32),
                        ((0, 4), (0, 0)))                                 # (8, cp)

    out_flat = pl.pallas_call(
        _basic_block1d_kernel,
        out_shape=jax.ShapeDtypeStruct((m_total, cp), jnp.bfloat16),
        grid=(num_tiles,),
        in_specs=[
            pl.BlockSpec((m_tile, cp), lambda g: (g, 0)),      # activations
            pl.BlockSpec((m_tile, 1), lambda g: (0, 0)),       # pad-row mask (resident)
            pl.BlockSpec((cp, 3 * cp), lambda g: (0, 0)),      # conv1 weights (resident)
            pl.BlockSpec((cp, 3 * cp), lambda g: (0, 0)),      # conv2 weights (resident)
            pl.BlockSpec((8, cp), lambda g: (0, 0)),           # folded BN params
        ],
        out_specs=pl.BlockSpec((m_tile, cp), lambda g: (g, 0)),
        compiler_params=pltpu.CompilerParams(
            dimension_semantics=("parallel",),                 # shards across v7x's 2 TCs
            vmem_limit_bytes=vmem_limit),
    )(x_flat, mask, w1_wide, w2_wide, bn_packed)

    out = out_flat.reshape(n_pad, rpb, cp)[:N, 1:L + 1, :C_mid]           # (N, L, C)
    return jnp.transpose(out, (0, 2, 1)).astype(jnp.float32)              # (N, C, L)


def reference_forward(x_ncl, w1, bn1, w2, bn2, eps=1e-5):
    """Pure-JAX reference mirroring the kernel's mixed precision: conv operands
    (activations + weights) rounded to bf16, accumulation / BN / residual in f32."""
    dn = ("NCH", "OIH", "NCH")

    def q(a):
        return a.astype(jnp.bfloat16).astype(jnp.float32)

    def conv(x, w):
        return jax.lax.conv_general_dilated(
            q(x), q(w), window_strides=(1,), padding=((1, 1),),
            dimension_numbers=dn)

    def bn(x, p):
        gamma, beta, mean, var = p
        scale = gamma / jnp.sqrt(var + eps)
        shift = beta - mean * scale
        return x * scale.reshape(1, -1, 1) + shift.reshape(1, -1, 1)

    identity = q(x_ncl)
    out = jax.nn.relu(bn(conv(x_ncl, w1), bn1))
    out = bn(conv(out, w2), bn2)
    return jax.nn.relu(out + identity)


if __name__ == "__main__":
    # Small shapes consistent with the module: in_planes == planes so the
    # identity shortcut (downsample=None) is valid.
    N, C, L = 2, 8, 16

    key = jax.random.PRNGKey(0)
    ks = jax.random.split(key, 11)

    x = jax.random.normal(ks[0], (N, C, L), dtype=jnp.float32)

    w1 = jax.random.normal(ks[1], (C, C, 3), dtype=jnp.float32) * 0.2
    w2 = jax.random.normal(ks[2], (C, C, 3), dtype=jnp.float32) * 0.2

    bn1 = (jax.random.uniform(ks[3], (C,), minval=0.5, maxval=1.5),   # gamma
           jax.random.normal(ks[4], (C,)) * 0.1,                      # beta
           jax.random.normal(ks[5], (C,)) * 0.1,                      # running_mean
           jax.random.uniform(ks[6], (C,), minval=0.5, maxval=1.5))   # running_var
    bn2 = (jax.random.uniform(ks[7], (C,), minval=0.5, maxval=1.5),
           jax.random.normal(ks[8], (C,)) * 0.1,
           jax.random.normal(ks[9], (C,)) * 0.1,
           jax.random.uniform(ks[10], (C,), minval=0.5, maxval=1.5))

    out = basic_block1d(x, w1, bn1, w2, bn2)
    out = jax.block_until_ready(out)

    ref = reference_forward(x, w1, bn1, w2, bn2)
    assert out.shape == (N, C, L)
    # bf16 MXU operands + bf16 output store, f32 accumulation: tolerance covers
    # occasional double-rounding differences vs. the mirrored-precision reference.
    assert jnp.allclose(out, ref, atol=5e-2, rtol=5e-2), "mismatch vs reference"

    print("KERNEL_OK")
</pallas_src>

<mosaic_0001>
module attributes {stable_mosaic.version = 11 : i64} {
  func.func @_basic_block1d_kernel(%arg0: i32, %arg1: memref<32x128xbf16, #tpu.memory_space<vmem>>, %arg2: memref<32x1xf32, #tpu.memory_space<vmem>>, %arg3: memref<128x384xbf16, #tpu.memory_space<vmem>>, %arg4: memref<128x384xbf16, #tpu.memory_space<vmem>>, %arg5: memref<8x128xf32, #tpu.memory_space<vmem>>, %arg6: memref<32x128xbf16, #tpu.memory_space<vmem>>) attributes {dimension_semantics = [#tpu.dimension_semantics<parallel>], iteration_bounds = array<i64: 2>, scalar_prefetch = 0 : i64, scratch_operands = 0 : i64, tpu.core_type = #tpu.core_type<tc>, window_params = [{transform_indices = @transform_0, window_bounds = array<i64: 32, 128>}, {pipeline_mode = #tpu.pipeline_mode<synchronous>, transform_indices = @transform_1, window_bounds = array<i64: 32, 1>}, {pipeline_mode = #tpu.pipeline_mode<synchronous>, transform_indices = @transform_2, window_bounds = array<i64: 128, 384>}, {pipeline_mode = #tpu.pipeline_mode<synchronous>, transform_indices = @transform_3, window_bounds = array<i64: 128, 384>}, {pipeline_mode = #tpu.pipeline_mode<synchronous>, transform_indices = @transform_4, window_bounds = array<i64: 8, 128>}, {transform_indices = @transform_5, window_bounds = array<i64: 32, 128>}]} {
    %c0 = arith.constant 0 : index
    %c0_0 = arith.constant 0 : index
    %0 = vector.load %arg5[%c0, %c0_0] : memref<8x128xf32, #tpu.memory_space<vmem>>, vector<1x128xf32>
    %c1 = arith.constant 1 : index
    %c0_1 = arith.constant 0 : index
    %1 = vector.load %arg5[%c1, %c0_1] : memref<8x128xf32, #tpu.memory_space<vmem>>, vector<1x128xf32>
    %c2 = arith.constant 2 : index
    %c0_2 = arith.constant 0 : index
    %2 = vector.load %arg5[%c2, %c0_2] : memref<8x128xf32, #tpu.memory_space<vmem>>, vector<1x128xf32>
    %c3 = arith.constant 3 : index
    %c0_3 = arith.constant 0 : index
    %3 = vector.load %arg5[%c3, %c0_3] : memref<8x128xf32, #tpu.memory_space<vmem>>, vector<1x128xf32>
    %c0_4 = arith.constant 0 : index
    %c0_5 = arith.constant 0 : index
    %4 = vector.load %arg1[%c0_4, %c0_5] : memref<32x128xbf16, #tpu.memory_space<vmem>>, vector<32x128xbf16>
    %c0_6 = arith.constant 0 : index
    %c0_7 = arith.constant 0 : index
    %5 = vector.load %arg3[%c0_6, %c0_7] : memref<128x384xbf16, #tpu.memory_space<vmem>>, vector<128x384xbf16>
    %cst = arith.constant dense<0.000000e+00> : vector<32x384xf32>
    %6 = tpu.matmul %4, %5, %cst {dimension_numbers = #tpu.dot_dimension_numbers<[1], [0], [0], [1], [0, 0, 1, 1], [], []>} : vector<32x128xbf16>, vector<128x384xbf16>, vector<32x384xf32> -> vector<32x384xf32>
    %7 = vector.extract_strided_slice %6 {offsets = [0, 0], sizes = [32, 128], strides = [1, 1]} : vector<32x384xf32> to vector<32x128xf32>
    %c1_i32 = arith.constant 1 : i32
    %8 = tpu.dynamic_rotate %7 by %c1_i32 dim 0 : vector<32x128xf32>, i32 -> vector<32x128xf32>
    %9 = vector.extract_strided_slice %6 {offsets = [0, 128], sizes = [32, 128], strides = [1, 1]} : vector<32x384xf32> to vector<32x128xf32>
    %10 = arith.addf %8, %9 : vector<32x128xf32>
    %11 = vector.extract_strided_slice %6 {offsets = [0, 256], sizes = [32, 128], strides = [1, 1]} : vector<32x384xf32> to vector<32x128xf32>
    %c31_i32 = arith.constant 31 : i32
    %12 = tpu.dynamic_rotate %11 by %c31_i32 dim 0 : vector<32x128xf32>, i32 -> vector<32x128xf32>
    %13 = arith.addf %10, %12 : vector<32x128xf32>
    %14 = vector.broadcast %0 : vector<1x128xf32> to vector<32x128xf32>
    %15 = arith.mulf %13, %14 : vector<32x128xf32>
    %16 = vector.broadcast %1 : vector<1x128xf32> to vector<32x128xf32>
    %17 = arith.addf %15, %16 : vector<32x128xf32>
    %cst_8 = arith.constant 0.000000e+00 : f32
    %18 = vector.broadcast %cst_8 : f32 to vector<32x128xf32>
    %19 = arith.maximumf %17, %18 : vector<32x128xf32>
    %c0_9 = arith.constant 0 : index
    %c0_10 = arith.constant 0 : index
    %20 = vector.load %arg2[%c0_9, %c0_10] : memref<32x1xf32, #tpu.memory_space<vmem>>, vector<32x1xf32>
    %21 = vector.broadcast %20 : vector<32x1xf32> to vector<32x128xf32>
    %22 = arith.mulf %19, %21 : vector<32x128xf32>
    %23 = arith.truncf %22 : vector<32x128xf32> to vector<32x128xbf16>
    %c0_11 = arith.constant 0 : index
    %c0_12 = arith.constant 0 : index
    %24 = vector.load %arg4[%c0_11, %c0_12] : memref<128x384xbf16, #tpu.memory_space<vmem>>, vector<128x384xbf16>
    %cst_13 = arith.constant dense<0.000000e+00> : vector<32x384xf32>
    %25 = tpu.matmul %23, %24, %cst_13 {dimension_numbers = #tpu.dot_dimension_numbers<[1], [0], [0], [1], [0, 0, 1, 1], [], []>} : vector<32x128xbf16>, vector<128x384xbf16>, vector<32x384xf32> -> vector<32x384xf32>
    %26 = vector.extract_strided_slice %25 {offsets = [0, 0], sizes = [32, 128], strides = [1, 1]} : vector<32x384xf32> to vector<32x128xf32>
    %c1_i32_14 = arith.constant 1 : i32
    %27 = tpu.dynamic_rotate %26 by %c1_i32_14 dim 0 : vector<32x128xf32>, i32 -> vector<32x128xf32>
    %28 = vector.extract_strided_slice %25 {offsets = [0, 128], sizes = [32, 128], strides = [1, 1]} : vector<32x384xf32> to vector<32x128xf32>
    %29 = arith.addf %27, %28 : vector<32x128xf32>
    %30 = vector.extract_strided_slice %25 {offsets = [0, 256], sizes = [32, 128], strides = [1, 1]} : vector<32x384xf32> to vector<32x128xf32>
    %c31_i32_15 = arith.constant 31 : i32
    %31 = tpu.dynamic_rotate %30 by %c31_i32_15 dim 0 : vector<32x128xf32>, i32 -> vector<32x128xf32>
    %32 = arith.addf %29, %31 : vector<32x128xf32>
    %33 = vector.broadcast %2 : vector<1x128xf32> to vector<32x128xf32>
    %34 = arith.mulf %32, %33 : vector<32x128xf32>
    %35 = vector.broadcast %3 : vector<1x128xf32> to vector<32x128xf32>
    %36 = arith.addf %34, %35 : vector<32x128xf32>
    %c0_16 = arith.constant 0 : index
    %c0_17 = arith.constant 0 : index
    %37 = vector.load %arg1[%c0_16, %c0_17] : memref<32x128xbf16, #tpu.memory_space<vmem>>, vector<32x128xbf16>
    %38 = arith.extf %37 : vector<32x128xbf16> to vector<32x128xf32>
    %39 = arith.addf %36, %38 : vector<32x128xf32>
    %cst_18 = arith.constant 0.000000e+00 : f32
    %40 = vector.broadcast %cst_18 : f32 to vector<32x128xf32>
    %41 = arith.maximumf %39, %40 : vector<32x128xf32>
    %42 = arith.truncf %41 : vector<32x128xf32> to vector<32x128xbf16>
    %c0_19 = arith.constant 0 : index
    %c0_20 = arith.constant 0 : index
    %43 = vector.load %arg6[%c0_19, %c0_20] : memref<32x128xbf16, #tpu.memory_space<vmem>>, vector<32x128xbf16>
    tpu.vector_store %arg6[%c0_19, %c0_20], %42 {strides = array<i32>} : memref<32x128xbf16, #tpu.memory_space<vmem>>, vector<32x128xbf16>,
    return
  }
  func.func @transform_0(%arg0: i32) -> (i32, i32) {
    %c0_i32 = arith.constant 0 : i32
    %c0_i32_0 = arith.constant 0 : i32
    return %arg0, %c0_i32 : i32, i32
  }
  func.func @transform_1(%arg0: i32) -> (i32, i32) {
    %c0_i32 = arith.constant 0 : i32
    %c0_i32_0 = arith.constant 0 : i32
    %c0_i32_1 = arith.constant 0 : i32
    return %c0_i32, %c0_i32_0 : i32, i32
  }
  func.func @transform_2(%arg0: i32) -> (i32, i32) {
    %c0_i32 = arith.constant 0 : i32
    %c0_i32_0 = arith.constant 0 : i32
    %c0_i32_1 = arith.constant 0 : i32
    return %c0_i32, %c0_i32_0 : i32, i32
  }
  func.func @transform_3(%arg0: i32) -> (i32, i32) {
    %c0_i32 = arith.constant 0 : i32
    %c0_i32_0 = arith.constant 0 : i32
    %c0_i32_1 = arith.constant 0 : i32
    return %c0_i32, %c0_i32_0 : i32, i32
  }
  func.func @transform_4(%arg0: i32) -> (i32, i32) {
    %c0_i32 = arith.constant 0 : i32
    %c0_i32_0 = arith.constant 0 : i32
    %c0_i32_1 = arith.constant 0 : i32
    return %c0_i32, %c0_i32_0 : i32, i32
  }
  func.func @transform_5(%arg0: i32) -> (i32, i32) {
    %c0_i32 = arith.constant 0 : i32
    %c0_i32_0 = arith.constant 0 : i32
    return %arg0, %c0_i32 : i32, i32
  }
}

</mosaic_0001>

<bundles_post_ra>
// kernel: tpu_custom_call.1
= control target key start
LH: loop header
LB: loop body
LE: loop exit
PB: predicated region body
PF: predicated region fallthrough
CT: control target
= control target key end

     0   :  { %10 = vsyncpa [#allocation3], 0  ;;  %s1760_s0 = inlined_call_operand.vmem [shape: bf16[64,128], index: 0, kind: input, shape index: {}]   ;;  %s1761_s1 = inlined_call_operand.vmem [shape: f32[32,1], index: 1, kind: input, shape index: {}]   ;;  %s1762_s2 = inlined_call_operand.hbm [shape: bf16[128,384], index: 2, kind: input, shape index: {}]   ;;  %s1763_s3 = inlined_call_operand.hbm [shape: bf16[128,384], index: 3, kind: input, shape index: {}]   ;;  %s1764_s4 = inlined_call_operand.hbm [shape: f32[8,128], index: 4, kind: input, shape index: {}]   ;;  %s1765_s5 = inlined_call_operand.hbm [shape: bf16[64,128], index: 5, kind: output, shape index: {}]  }
   0x1   :  { %11 = vsyncpa [#allocation6], 0 }
   0x2   :  { %12 = vsyncpa [#allocation4], 0 }
   0x3   :  { %14 = vsyncpa [#allocation4 + $0x1], 0  ;;  %s1540_s18 = smov 0   ;;  %s1542_s19 = smov 0  }
   0x4   :  { %s1544_s20 = smov 0   ;;  %s1546_s21 = smov 0  }
   0x5 LB: > { %s1561_s22 = sadd.s32 4294967295, %s1500_s21   ;;  %s963_s23 = sadd.s32 4294967294, %s1500_s21   ;;  %s1500_s21 = sphi %s1546_s21, %s1774_s21   ;;  %s1496_s20 = sphi %s1544_s20, %s1773_s20   ;;  %s1492_s19 = sphi %s1542_s19, %s1772_s19   ;;  %s1488_s18 = sphi %s1540_s18, %s1771_s18  }
   0x6   : > { %s1565_s24 = sadd.s32 1, %s1500_s21   ;;  %s137_s25 = sadd.s32 1, %s1496_s20 }
   0x7   : > { %s134_s26 = ssub.s32 %s1500_s21, %s1565_s24  ;;  %p147_p0 = scmp.ne.s32.totalorder %s1496_s20, %s1492_s19 }
   0x8   : > { %p135_p1 = scmp.eq.s32.totalorder %s134_s26, 0  ;;  %p148_p2 = scmp.eq.s32.totalorder %s1561_s22, 1 }
   0x9   : > { %p153_p3 = scmp.ne.s32.totalorder %s1492_s19, %s1488_s18  ;;  %p154_p4 = scmp.eq.s32.totalorder %s963_s23, 1 }
   0xa   : > { %s1576_s27 = scalar_select %p135_p1, %s1496_s20, %s137_s25  }
   0xb   : > { %p1578_p5 = por %p148_p2, %p147_p0  ;;  %p1582_p6 = por %p154_p4, %p153_p3 }
   0xc   : > { %p964_p7 = scmp.ge.s32.totalorder %s1500_s21, 1  ;;  %p161_p8 = scmp.lt.s32.totalorder %s1500_s21, 3 }
   0xd   : > { %p1287_p9 = scmp.eq.s32.totalorder %s1561_s22, 0  ;;  %s189_s8 = sshll.u32 %s1763_s3, 4  ;;  %s190_s8 = int_to_ptr.hbm [resolvable:$true] %s189_s8 }
   0xe   : > { %p1589_p10 = pnand %p964_p7, %p161_p8  ;;  %s175_s11 = sshll.u32 %s1762_s2, 4  ;;  %s176_s11 = int_to_ptr.hbm [resolvable:$true] %s175_s11 }
   0xf   : > { %s1502_s13 = smov [#allocation5]   ;;  %s1503_s15 = smov 192  }
  0x10   : > { %p1273_p11 = pneg %p1589_p10  ;;  %s191_s14 = sshll.u32 %s1502_s13, 4  ;;  %s192_s14 = int_to_ptr.vmem [resolvable:$true] %s191_s14 }
  0x11   : > { %s1504_s16 = smov 12   ;;  %s1505_s17 = smov [#allocation2]  }
  0x12   : > { %p1603_p12 = pnand %p1287_p9, %p1273_p11  ;;  %s177_s23 = sshll.u32 %s1505_s17, 4  ;;  %s178_s23 = int_to_ptr.vmem [resolvable:$true] %s177_s23 }
  0x13   : > { %s204_s6 = sshll.u32 %s1764_s4, 4  ;;  %s1506_s7 = smov [#allocation7]   ;;  %s205_s6 = int_to_ptr.hbm [resolvable:$true] %s204_s6 }
  0x14   : > { %1279 = dma.hbm_to_vmem [thread:$0]  (!%p1603_p12), %s190_s8, 3072, %s192_s14, [#allocation6], %s1503_s15, %s1503_s15, %s1504_s16  }
  0x15   : > { %1276 = dma.hbm_to_vmem [thread:$0]  (!%p1603_p12), %s176_s11, 3072, %s178_s23, [#allocation3], %s1503_s15, %s1503_s15, %s1504_s16  }
  0x16   : > { %s206_s9 = sshll.u32 %s1506_s7, 4  ;;  %228 = sbr.rel (%p1589_p10) target bundleno = 422 (0x1a6), region = 40  ;;  %s207_s9 = int_to_ptr.vmem [resolvable:$true] %s206_s9 }
  0x17   : > { %1282 = dma.hbm_to_vmem [thread:$0]  (!%p1603_p12), %s205_s6, 128, %s207_s9, [#allocation6]  }
  0x1b   : > { %1475 = dma.done.wait (%p1287_p9), [#allocation3], 3072  }
  0x1c   : > { %1477 = vsyncadd (%p1287_p9), [#allocation3], 4294964224 }
  0x1d   : > { %1479 = dma.done.wait (%p1287_p9), [#allocation6], 3200  }
  0x1e   : > { %1481 = vsyncadd (%p1287_p9), [#allocation6], 4294964096  ;;  %v1070_v0 = vld [vmem:[#allocation2 + $0xa8] sm:$0xf]  ;;  %v1205_v1 = vld [vmem:[#allocation2 + $0xb0] sm:$0xf0] }
  0x1f   : > { %v1078_v2 = vld [vmem:[#allocation2 + $0xb0] sm:$0xf]  ;;  %v1071_v3 = vor.u32 %v1205_v1, %v1070_v0  ;;  %v1206_v4 = vld [vmem:[#allocation2 + $0xb8] sm:$0xf0]  ;;  %v1204_v5 = vld [vmem:[#allocation2 + $0xac] sm:$0xf] }
  0x20   : > { %v1072_v6 = vld [vmem:[#allocation2 + $0xb4] sm:$0xf0]  ;;  %v1079_v7 = vor.u32 %v1206_v4, %v1078_v2  ;;  %v1058_v9 = vld [vmem:[#allocation2 + $0x90] sm:$0xf]  ;;  %v1202_v10 = vld [vmem:[#allocation2 + $0x98] sm:$0xf0] }
  0x21   : > { %v1075_v8 = vor.u32 %v1204_v5, %v1072_v6  ;;  %v1066_v11 = vld [vmem:[#allocation2 + $0x98] sm:$0xf]  ;;  %454 = vmatpush.bf16.msra.mxu0 %v1071_v3  ;;  %v1059_v12 = vor.u32 %v1202_v10, %v1058_v9  ;;  %v1203_v13 = vld [vmem:[#allocation2 + $0xa0] sm:$0xf0]  ;;  %v1201_v14 = vld [vmem:[#allocation2 + $0x94] sm:$0xf] }
  0x22   : > { %v1060_v15 = vld [vmem:[#allocation2 + $0x9c] sm:$0xf0]  ;;  %492 = vmatpush.bf16.msra.mxu2 %v1079_v7  ;;  %v1067_v16 = vor.u32 %v1203_v13, %v1066_v11  ;;  %v1046_v18 = vld [vmem:[#allocation2 + $0x78] sm:$0xf]  ;;  %v1199_v19 = vld [vmem:[#allocation2 + $0x80] sm:$0xf0] }
  0x23   : > { %473 = vmatpush.bf16.msra.mxu1 %v1075_v8  ;;  %v1063_v17 = vor.u32 %v1201_v14, %v1060_v15  ;;  %v1054_v20 = vld [vmem:[#allocation2 + $0x80] sm:$0xf]  ;;  %v1200_v21 = vld [vmem:[#allocation2 + $0x88] sm:$0xf0]  ;;  %v1198_v22 = vld [vmem:[#allocation2 + $0x7c] sm:$0xf]  ;;  %v1047_v24 = vor.u32 %v1199_v19, %v1046_v18 }
  0x24   : > { %v1048_v23 = vld [vmem:[#allocation2 + $0x84] sm:$0xf0]  ;;  %v1055_v25 = vor.u32 %v1200_v21, %v1054_v20  ;;  %v1034_v27 = vld [vmem:[#allocation2 + $0x60] sm:$0xf]  ;;  %v1196_v28 = vld [vmem:[#allocation2 + $0x68] sm:$0xf0] }
  0x25   : > { %455 = vmatpush.bf16.msra.mxu0 %v1059_v12  ;;  %v1051_v26 = vor.u32 %v1198_v22, %v1048_v23  ;;  %v1042_v29 = vld [vmem:[#allocation2 + $0x68] sm:$0xf]  ;;  %v1197_v30 = vld [vmem:[#allocation2 + $0x70] sm:$0xf0]  ;;  %v1195_v31 = vld [vmem:[#allocation2 + $0x64] sm:$0xf]  ;;  %v1035_v33 = vor.u32 %v1196_v28, %v1034_v27 }
  0x26   : > { %493 = vmatpush.bf16.msra.mxu2 %v1067_v16  ;;  %v1036_v32 = vld [vmem:[#allocation2 + $0x6c] sm:$0xf0]  ;;  %s974_s30 = sshll.u32 %s1561_s22, 2  ;;  %v1043_v34 = vor.u32 %v1197_v30, %v1042_v29  ;;  %v1022_v36 = vld [vmem:[#allocation2 + $0x48] sm:$0xf]  ;;  %v553_v52 = vld [vmem:[%s1761_s1] sm:$0xff] }
  0x27   : > { %474 = vmatpush.bf16.msra.mxu1 %v1063_v17  ;;  %v1039_v35 = vor.u32 %v1195_v31, %v1036_v32  ;;  %v1193_v37 = vld [vmem:[#allocation2 + $0x50] sm:$0xf0]  ;;  %v1030_v38 = vld [vmem:[#allocation2 + $0x50] sm:$0xf]  ;;  %v1194_v39 = vld [vmem:[#allocation2 + $0x58] sm:$0xf0] }
  0x28   : > { %v1192_v40 = vld [vmem:[#allocation2 + $0x4c] sm:$0xf]  ;;  %v1024_v41 = vld [vmem:[#allocation2 + $0x54] sm:$0xf0]  ;;  %v1010_v42 = vld [vmem:[#allocation2 + $0x30] sm:$0xf]  ;;  %v1023_v43 = vor.u32 %v1193_v37, %v1022_v36  ;;  %v1031_v47 = vor.u32 %v1194_v39, %v1030_v38 }
  0x29   : > { %456 = vmatpush.bf16.msra.mxu0 %v1047_v24  ;;  %p1627_p13 = scmp.lt.s32.totalorder %s974_s30, 7  ;;  %v1190_v44 = vld [vmem:[#allocation2 + $0x38] sm:$0xf0]  ;;  %v1018_v45 = vld [vmem:[#allocation2 + $0x38] sm:$0xf]  ;;  %v1027_v48 = vor.u32 %v1192_v40, %v1024_v41  ;;  %v555_v53 = vld [vmem:[%s1761_s1 + $0x10] sm:$0xff] }
  0x2a   : > { %494 = vmatpush.bf16.msra.mxu2 %v1055_v25  ;;  %v1191_v46 = vld [vmem:[#allocation2 + $0x40] sm:$0xf0]  ;;  %v1189_v49 = vld [vmem:[#allocation2 + $0x34] sm:$0xf]  ;;  %v1012_v50 = vld [vmem:[#allocation2 + $0x3c] sm:$0xf0]  ;;  %v1011_v51 = vor.u32 %v1190_v44, %v1010_v42 }
  0x2b   : > { %475 = vmatpush.bf16.msra.mxu1 %v1051_v26  ;;  %s1776_s30 = smov (!%p1627_p13, %s974_s30), 7  ;;  %v1019_v54 = vor.u32 %v1191_v46, %v1018_v45  ;;  %v1015_v55 = vor.u32 %v1189_v49, %v1012_v50  ;;  %v998_v56 = vld [vmem:[#allocation2 + $0x18] sm:$0xf]  ;;  %v1187_v57 = vld [vmem:[#allocation2 + $0x20] sm:$0xf0]  ;;  %v1507_v62 = vmov 0  }
  0x2c   : > { %v1006_v58 = vld [vmem:[#allocation2 + $0x20] sm:$0xf]  ;;  %v1188_v59 = vld [vmem:[#allocation2 + $0x28] sm:$0xf0]  ;;  %v1186_v60 = vld [vmem:[#allocation2 + $0x1c] sm:$0xf]  ;;  %1334 = vset.pattern.permute.xlu0 %v1507_v62  ;;  %1335 = vset.pattern.permute.xlu1 %v1507_v62  ;;  %v999_v63 = vor.u32 %v1187_v57, %v998_v56 }
  0x2d   : > { %457 = vmatpush.bf16.msra.mxu0 %v1035_v33  ;;  %v1000_v61 = vld [vmem:[#allocation2 + $0x24] sm:$0xf0]  ;;  %559 = vperm.xlu0 %1334, %v553_v52   ;;  %s975_s14 = sshll.u32 %s1776_s30, 2  ;;  %v1007_v0 = vor.u32 %v1188_v59, %v1006_v58  ;;  %v986_v2 = vld [vmem:[#allocation2] sm:$0xf]  ;;  %v556_v10 = vld [vmem:[%s1761_s1 + $0x18] sm:$0xff] }
  0x2e   : > { %495 = vmatpush.bf16.msra.mxu2 %v1043_v34  ;;  %569 = vperm.xlu1 %1335, %v555_v53   ;;  %v1003_v1 = vor.u32 %v1186_v60, %v1000_v61  ;;  %v1184_v3 = vld [vmem:[#allocation2 + $0x8] sm:$0xf0]  ;;  %v994_v4 = vld [vmem:[#allocation2 + $0x8] sm:$0xf]  ;;  %v1185_v5 = vld [vmem:[#allocation2 + $0x10] sm:$0xf0]  ;;  %s1645_s17 = scalar_lea.vmem %s1760_s0, %s975_s14 }
  0x2f   : > { %476 = vmatpush.bf16.msra.mxu1 %v1039_v35  ;;  %v1183_v6 = vld [vmem:[#allocation2 + $0x4] sm:$0xf]  ;;  %v988_v7 = vld [vmem:[#allocation2 + $0xc] sm:$0xf0]  ;;  %v987_v8 = vor.u32 %v1184_v3, %v986_v2  ;;  %v554_v9 = vld [vmem:[%s1761_s1 + $0x8] sm:$0xff]  ;;  %v995_v11 = vor.u32 %v1185_v5, %v994_v4  ;;  %s264_s7 = sand.u32 1, %s1492_s19  }
  0x30   : > { %v991_v12 = vor.u32 %v1183_v6, %v988_v7  ;;  %v1181_v13 = vld [vmem:[%s1645_s17] sm:$0xff]  ;;  %v1182_v14 = vld [vmem:[%s1645_s17 + $0x8] sm:$0xff]  ;;  %v1229_v16 = vld [vmem:[#allocation5 + $0xb0] sm:$0xf0]  ;;  %s973_s9 = sshll.u32 %s264_s7, 4  ;;  %s1231_s30 = sshll.u32 %s1561_s22, 4 }
  0x31   : > { %458 = vmatpush.bf16.msra.mxu0 %v1023_v43  ;;  %v1166_v15 = vld [vmem:[#allocation5 + $0xa8] sm:$0xf]  ;;  %v1228_v18 = vld [vmem:[#allocation5 + $0xac] sm:$0xf]  ;;  %v1168_v19 = vld [vmem:[#allocation5 + $0xb4] sm:$0xf0]  ;;  %s866_s11 = scalar_lea.hbm %s1765_s5, %s1231_s30 }
  0x32   : > { %496 = vmatpush.bf16.msra.mxu2 %v1031_v47  ;;  %v1167_v17 = vor.u32 %v1229_v16, %v1166_v15  ;;  %v1174_v20 = vld [vmem:[#allocation5 + $0xb0] sm:$0xf]  ;;  %v1171_v21 = vor.u32 %v1228_v18, %v1168_v19  ;;  %v1230_v22 = vld [vmem:[#allocation5 + $0xb8] sm:$0xf0]  ;;  %v1225_v26 = vld [vmem:[#allocation5 + $0x94] sm:$0xf] }
  0x33   : > { %477 = vmatpush.bf16.msra.mxu1 %v1027_v48  ;;  %v1655_v23 = vor.u32 %v1230_v22, %v1174_v20  ;;  %v1154_v24 = vld [vmem:[#allocation5 + $0x90] sm:$0xf]  ;;  %v1226_v25 = vld [vmem:[#allocation5 + $0x98] sm:$0xf0]  ;;  %v1156_v28 = vld [vmem:[#allocation5 + $0x9c] sm:$0xf0] }
  0x34   : > { %743 = vmatpush.bf16.msra.mxu3 %v1167_v17  ;;  %v1155_v27 = vor.u32 %v1226_v25, %v1154_v24  ;;  %v1162_v29 = vld [vmem:[#allocation5 + $0x98] sm:$0xf]  ;;  %v1227_v30 = vld [vmem:[#allocation5 + $0xa0] sm:$0xf0]  ;;  %v1159_v31 = vor.u32 %v1225_v26, %v1156_v28  ;;  %v1222_v35 = vld [vmem:[#allocation5 + $0x7c] sm:$0xf] }
  0x35   : > { %459 = vmatpush.bf16.msra.mxu0 %v1011_v51  ;;  %564 = vperm.xlu0 %1334, %v554_v9   ;;  %v1658_v32 = vor.u32 %v1227_v30, %v1162_v29  ;;  %v1142_v33 = vld [vmem:[#allocation5 + $0x78] sm:$0xf]  ;;  %v1223_v34 = vld [vmem:[#allocation5 + $0x80] sm:$0xf0]  ;;  %v1144_v37 = vld [vmem:[#allocation5 + $0x84] sm:$0xf0]  ;;  %v515_v29 = vlaneseq }
  0x36   : > { %497 = vmatpush.bf16.msra.mxu2 %v1019_v54  ;;  %574 = vperm.xlu1 %1335, %v556_v10   ;;  %v1143_v36 = vor.u32 %v1223_v34, %v1142_v33  ;;  %v1150_v38 = vld [vmem:[#allocation5 + $0x80] sm:$0xf]  ;;  %v1224_v39 = vld [vmem:[#allocation5 + $0x88] sm:$0xf0]  ;;  %v1147_v40 = vor.u32 %v1222_v35, %v1144_v37  ;;  %v1219_v44 = vld [vmem:[#allocation5 + $0x64] sm:$0xf] }
  0x37   : > { %478 = vmatpush.bf16.msra.mxu1 %v1015_v55  ;;  %v1661_v41 = vor.u32 %v1224_v39, %v1150_v38  ;;  %v1130_v42 = vld [vmem:[#allocation5 + $0x60] sm:$0xf]  ;;  %v1220_v43 = vld [vmem:[#allocation5 + $0x68] sm:$0xf0]  ;;  %v1132_v46 = vld [vmem:[#allocation5 + $0x6c] sm:$0xf0] }
  0x38   : > { %744 = vmatpush.bf16.msra.mxu3 %v1155_v27  ;;  %v1131_v45 = vor.u32 %v1220_v43, %v1130_v42  ;;  %v1138_v47 = vld [vmem:[#allocation5 + $0x68] sm:$0xf]  ;;  %v1221_v48 = vld [vmem:[#allocation5 + $0x70] sm:$0xf0]  ;;  %v1135_v49 = vor.u32 %v1219_v44, %v1132_v46  ;;  %v1216_v53 = vld [vmem:[#allocation5 + $0x4c] sm:$0xf] }
  0x39   : > { %460 = vmatpush.bf16.msra.mxu0 %v999_v63  ;;  %v1664_v50 = vor.u32 %v1221_v48, %v1138_v47  ;;  %v1118_v51 = vld [vmem:[#allocation5 + $0x48] sm:$0xf]  ;;  %v1217_v52 = vld [vmem:[#allocation5 + $0x50] sm:$0xf0]  ;;  %v1120_v55 = vld [vmem:[#allocation5 + $0x54] sm:$0xf0] }
  0x3a   : > { %498 = vmatpush.bf16.msra.mxu2 %v1007_v0  ;;  %v1119_v54 = vor.u32 %v1217_v52, %v1118_v51  ;;  %v1126_v56 = vld [vmem:[#allocation5 + $0x50] sm:$0xf]  ;;  %v1218_v57 = vld [vmem:[#allocation5 + $0x58] sm:$0xf0]  ;;  %v1123_v58 = vor.u32 %v1216_v53, %v1120_v55  ;;  %v1213_v63 = vld [vmem:[#allocation5 + $0x34] sm:$0xf] }
  0x3b   : > { %479 = vmatpush.bf16.msra.mxu1 %v1003_v1  ;;  %v1667_v59 = vor.u32 %v1218_v57, %v1126_v56  ;;  %v1106_v60 = vld [vmem:[#allocation5 + $0x30] sm:$0xf]  ;;  %v1214_v61 = vld [vmem:[#allocation5 + $0x38] sm:$0xf0]  ;;  %v1108_v0 = vld [vmem:[#allocation5 + $0x3c] sm:$0xf0] }
  0x3c   : > { %745 = vmatpush.bf16.msra.mxu3 %v1143_v36  ;;  %v1107_v62 = vor.u32 %v1214_v61, %v1106_v60  ;;  %v1114_v1 = vld [vmem:[#allocation5 + $0x38] sm:$0xf]  ;;  %v1111_v2 = vor.u32 %v1213_v63, %v1108_v0  ;;  %v1215_v3 = vld [vmem:[#allocation5 + $0x40] sm:$0xf0]  ;;  %v1210_v10 = vld [vmem:[#allocation5 + $0x1c] sm:$0xf] }
  0x3d   : > { %461 = vmatpush.bf16.msra.mxu0 %v987_v8  ;;  %v1672_v5 = vor.u32 %v1215_v3, %v1114_v1  ;;  %v1094_v7 = vld [vmem:[#allocation5 + $0x18] sm:$0xf]  ;;  %v1211_v8 = vld [vmem:[#allocation5 + $0x20] sm:$0xf0]  ;;  %v1082_v16 = vld [vmem:[#allocation5] sm:$0xf] }
  0x3e   : > { %499 = vmatpush.bf16.msra.mxu2 %v995_v11  ;;  %v1095_v9 = vor.u32 %v1211_v8, %v1094_v7  ;;  %v1096_v11 = vld [vmem:[#allocation5 + $0x24] sm:$0xf0]  ;;  %v1208_v17 = vld [vmem:[#allocation5 + $0x8] sm:$0xf0]  ;;  %v1207_v18 = vld [vmem:[#allocation5 + $0x4] sm:$0xf] }
  0x3f   : > { %480 = vmatpush.bf16.msra.mxu1 %v991_v12  ;;  %v1102_v12 = vld [vmem:[#allocation5 + $0x20] sm:$0xf]  ;;  %v1083_v19 = vor.u32 %v1208_v17, %v1082_v16  ;;  %v1084_v20 = vld [vmem:[#allocation5 + $0xc] sm:$0xf0]  ;;  %v1209_v22 = vld [vmem:[#allocation5 + $0x10] sm:$0xf0] }
  0x40   : > { %462 = vmatmul.bf16.vlgmr.msra.gmra.mxu0 %v1181_v13  ;;  %746 = vmatpush.bf16.msra.mxu3 %v1131_v45  ;;  %v1087_v25 = vor.u32 %v1207_v18, %v1084_v20  ;;  %v1680_v30 = vshrl.u32 %v515_v29, 7  ;;  %s266_s12 = scalar_lea.vmem [#allocation8], %s973_s9  ;;  %s869_s14 = sshll.u32 %s866_s11, 4  ;;  %s870_s14 = int_to_ptr.hbm [resolvable:$true] %s869_s14 }
  0x41   : > { %500 = vmatmul.bf16.vlgmr.msra.gmra.mxu2 %v1181_v13  ;;  %762 = vmatpush.bf16.msrb.mxu0 %v1171_v21  ;;  %s867_s13 = sshll.u32 %s266_s12, 4  ;;  %s855_s22 = scalar_lea.sflag [#allocation4], %s264_s7  ;;  %s868_s13 = int_to_ptr.vmem [resolvable:$true] %s867_s13 }
  0x42   : > { %481 = vmatmul.bf16.vlgmr.msra.gmra.mxu1 %v1181_v13  ;;  %1243 = vmatpush.bf16.msrb.mxu2 %v1171_v21  ;;  %v1099_v13 = vor.u32 %v1210_v10, %v1096_v11  ;;  %v1090_v21 = vld [vmem:[#allocation5 + $0x8] sm:$0xf]  ;;  %vm517_vm0 = vcmp.lt.s32.totalorder %v1680_v30, 1  ;;  %vm530_vm1 = vcmp.lt.s32.totalorder %v1680_v30, 7  ;;  %s1444_s15 = sshra.s32 %s870_s14, 4  ;;  %s1450_s25 = scalar_lea.hbm %s1765_s5, 32  ;;  %s1445_s15 = int_to_ptr.hbm [resolvable:$true] %s1444_s15 }
  0x43   : > { %781 = vmatpush.bf16.msrb.mxu1 %v1655_v23  ;;  %v1091_v26 = vor.u32 %v1209_v22, %v1090_v21  ;;  %s1446_s16 = scalar_lea.hbm %s1445_s15, 16  ;;  %p1451_p3 = scmp.lt.s32.totalorder %s1445_s15, %s1765_s5 }
  0x44   : > { %747 = vmatpush.bf16.msra.mxu3 %v1119_v54  ;;  %p1447_p0 = scmp.ne.s32.totalorder %s1445_s15, %s1446_s16  ;;  %p1452_p4 = scmp.lt.s32.totalorder %s1450_s25, %s1446_s16 }
  0x45   : > { %763 = vmatpush.bf16.msrb.mxu0 %v1159_v31 }
  0x46   : > { %1244 = vmatpush.bf16.msrb.mxu2 %v1159_v31  ;;  %p1448_p1 = pnand %p1447_p0, %p1578_p5  ;;  %p1453_p7 = por %p1452_p4, %p1451_p3 }
  0x47   : > { %782 = vmatpush.bf16.msrb.mxu1 %v1658_v32 }
  0x48   : > { %748 = vmatpush.bf16.msra.mxu3 %v1107_v62  ;;  %p1449_p2 = pneg %p1448_p1 }
  0x49   : > { %764 = vmatpush.bf16.msrb.mxu0 %v1147_v40 }
  0x4a   : > { %1245 = vmatpush.bf16.msrb.mxu2 %v1147_v40  ;;  %p1454_p8 = pnand %p1453_p7, %p1449_p2 }
  0x4b   : > { %783 = vmatpush.bf16.msrb.mxu1 %v1661_v41 }
  0x4c   : > { %749 = vmatpush.bf16.msra.mxu3 %v1095_v9 }
  0x4d   : > { %765 = vmatpush.bf16.msrb.mxu0 %v1135_v49 }
  0x4e   : > { %1246 = vmatpush.bf16.msrb.mxu2 %v1135_v49  ;;  %v1337_v49 = vld [vmem:[#allocation7 + $0x1] ss:$0 sm:$0xff] }
  0x4f   : > { %784 = vmatpush.bf16.msrb.mxu1 %v1664_v50 }
  0x50   : > { %467 = vmatmul.bf16.gmra.mxu0 %v1182_v14  ;;  %750 = vmatpush.bf16.msra.mxu3 %v1083_v19 }
  0x51   : > { %505 = vmatmul.bf16.gmra.mxu2 %v1182_v14  ;;  %766 = vmatpush.bf16.msrb.mxu0 %v1123_v58 }
  0x52   : > { %486 = vmatmul.bf16.gmra.mxu1 %v1182_v14  ;;  %1247 = vmatpush.bf16.msrb.mxu2 %v1123_v58  ;;  %v1212_v14 = vld [vmem:[#allocation5 + $0x28] sm:$0xf0] }
  0x53   : > { %785 = vmatpush.bf16.msrb.mxu1 %v1667_v59  ;;  %v1675_v15 = vor.u32 %v1212_v14, %v1102_v12 }
  0x54   : > { %1251 = vmatpush.bf16.msrb.mxu3 %v1655_v23 }
  0x55   : > { %767 = vmatpush.bf16.msrb.mxu0 %v1111_v2 }
  0x56   : > { %1248 = vmatpush.bf16.msrb.mxu2 %v1111_v2 }
  0x57   : > { %786 = vmatpush.bf16.msrb.mxu1 %v1672_v5 }
  0x58   : > { %1252 = vmatpush.bf16.msrb.mxu3 %v1658_v32 }
  0x59   : > { %768 = vmatpush.bf16.msrb.mxu0 %v1099_v13 }
  0x5a   : > { %1249 = vmatpush.bf16.msrb.mxu2 %v1099_v13 }
  0x5b   : > { %787 = vmatpush.bf16.msrb.mxu1 %v1675_v15 }
  0x5c   : > { %1253 = vmatpush.bf16.msrb.mxu3 %v1661_v41  ;;  %v1336_v41 = vld [vmem:[#allocation7] ss:$0 sm:$0xff] }
  0x5d   : > { %769 = vmatpush.bf16.msrb.mxu0 %v1087_v25 }
  0x5e   : > { %1250 = vmatpush.bf16.msrb.mxu2 %v1087_v25 }
  0x5f   : > { %788 = vmatpush.bf16.msrb.mxu1 %v1091_v26 }
  0x60   : > { %1254 = vmatpush.bf16.msrb.mxu3 %v1664_v50 }
  0x64   : > { %1255 = vmatpush.bf16.msrb.mxu3 %v1667_v59 }
  0x68   : > { %1256 = vmatpush.bf16.msrb.mxu3 %v1672_v5 }
  0x6c   : > { %1257 = vmatpush.bf16.msrb.mxu3 %v1675_v15 }
  0x70   : > { %1258 = vmatpush.bf16.msrb.mxu3 %v1091_v26 }
  0x9f   : > { %v560_v46 = vpop.permute.xlu0 %559 }
  0xa0   : > { %v570_v57 = vpop.permute.xlu1 %569 }
  0xa7   : > { %v565_v7 = vpop.permute.xlu0 %564 }
  0xa8   : > { %v575_v15 = vpop.permute.xlu1 %574 }
  0xbd   : > { %v1670_v4 = vpop.f32.mrf.mxu0 }
  0xbe   : > { %v511_v35 = vrot.slane %v1670_v4, 7 }
  0xbf   : > { %v482_v6 = vpop.f32.mrf.mxu1 }
  0xc4   : > { %v501_v24 = vpop.f32.mrf.mxu2 }
  0xc5   : > { %v465_v27 = vpop.f32.mrf.mxu0  ;;  %v526_v45 = vrot.slane %v501_v24, 1 }
  0xc6   : > { %v512_v34 = vrot.slane %v465_v27, 7 }
  0xc7   : > { %v484_v28 = vpop.f32.mrf.mxu1 }
  0xc8   : > { %v520_v23 = vsel %vm517_vm0, %v511_v35, %v512_v34 }
  0xc9   : > { %v523_v40 = vadd.f32 %v520_v23, %v484_v28 }
  0xcc   : > { %v503_v31 = vpop.f32.mrf.mxu2 }
  0xcd   : > { %v468_v33 = vpop.f32.mrf.mxu0  ;;  %v527_v38 = vrot.slane %v503_v31, 1 }
  0xce   : > { %v513_v43 = vrot.slane %v468_v33, 7 }
  0xcf   : > { %v487_v36 = vpop.f32.mrf.mxu1  ;;  %v533_v51 = vsel %vm530_vm1, %v526_v45, %v527_v38 }
  0xd0   : > { %v519_v53 = vsel %vm517_vm0, %v512_v34, %v513_v43 }
  0xd1   : > { %v524_v62 = vadd.f32 %v519_v53, %v487_v36 }
  0xd4   : > { %v506_v37 = vpop.f32.mrf.mxu2 }
  0xd5   : > { %v528_v32 = vrot.slane %v506_v37, 1  ;;  %v470_v39 = vpop.f32.mrf.mxu0  ;;  %v1338_v37 = vld [vmem:[#allocation7 + $0x2] ss:$0 sm:$0xff] }
  0xd6   : > { %v514_v42 = vrot.slane %v470_v39, 7 }
  0xd7   : > { %v532_v44 = vsel %vm530_vm1, %v527_v38, %v528_v32  ;;  %v489_v55 = vpop.f32.mrf.mxu1 }
  0xd8   : > { %v536_v47 = vadd.f32 %v532_v44, %v523_v40  ;;  %v521_v48 = vsel %vm517_vm0, %v514_v42, %v511_v35  ;;  %v518_v56 = vsel %vm517_vm0, %v513_v43, %v514_v42 }
  0xd9   : > { %v522_v50 = vadd.f32 %v521_v48, %v482_v6  ;;  %v525_v63 = vadd.f32 %v518_v56, %v489_v55 }
  0xda   : > { %v541_v52 = vmul.f32 %v1336_v41, %v536_v47 }
  0xdb   : > { %v535_v54 = vadd.f32 %v533_v51, %v522_v50 }
  0xdc   : > { %v546_v58 = vadd.f32 %v1337_v49, %v541_v52  ;;  %v508_v59 = vpop.f32.mrf.mxu2 }
  0xdd   : > { %v540_v60 = vmul.f32 %v1336_v41, %v535_v54  ;;  %v529_v61 = vrot.slane %v508_v59, 1 }
  0xde   : > { %v550_v1 = vmax.f32 %v546_v58, 0.0 }
  0xdf   : > { %v545_v0 = vadd.f32 %v1337_v49, %v540_v60  ;;  %v531_v2 = vsel %vm530_vm1, %v528_v32, %v529_v61  ;;  %v534_v3 = vsel %vm530_vm1, %v529_v61, %v526_v45  ;;  %v278_v45 = vld [vmem:[%s1645_s17] sm:$0xff]  }
  0xe0   : > { %v537_v4 = vadd.f32 %v531_v2, %v524_v62  ;;  %v538_v5 = vadd.f32 %v534_v3, %v525_v63  ;;  %v578_v11 = vmul.f32 %v565_v7, %v550_v1  ;;  %v834_v51 = vunpack.c.l.bf16 %v278_v45  ;;  %v280_v1 = vld [vmem:[%s1645_s17 + $0x8] sm:$0xff]  }
  0xe1   : > { %v549_v6 = vmax.f32 %v545_v0, 0.0  ;;  %v835_v54 = vunpack.c.h.bf16 %v278_v45 }
  0xe2   : > { %v542_v8 = vmul.f32 %v1336_v41, %v537_v4  ;;  %v543_v9 = vmul.f32 %v1336_v41, %v538_v5  ;;  %v1339_v41 = vld [vmem:[#allocation7 + $0x3] ss:$0 sm:$0xff] }
  0xe3   : > { %v577_v10 = vmul.f32 %v560_v46, %v549_v6 }
  0xe4   : > { %v547_v12 = vadd.f32 %v1337_v49, %v542_v8  ;;  %v548_v13 = vadd.f32 %v1337_v49, %v543_v9  ;;  %v836_v8 = vunpack.c.l.bf16 %v280_v1 }
  0xe5   : > { %v581_v14 = vpack.c.bf16 %v578_v11, %v577_v10 }
  0xe6   : > { %v551_v16 = vmax.f32 %v547_v12, 0.0  ;;  %v552_v17 = vmax.f32 %v548_v13, 0.0  ;;  %v837_v12 = vunpack.c.h.bf16 %v280_v1 }
  0xe7   : > { %751 = vmatmul.bf16.vlgmr.msra.gmra.mxu3 %v581_v14  ;;  %770 = vmatmul.bf16.vlgmr.msrb.gmra.mxu0 %v581_v14 }
  0xe8   : > { %v579_v18 = vmul.f32 %v570_v57, %v551_v16  ;;  %v580_v19 = vmul.f32 %v575_v15, %v552_v17  ;;  %789 = vmatmul.bf16.vlgmr.msrb.gmra.mxu1 %v581_v14 }
  0xea   : > { %v582_v20 = vpack.c.bf16 %v580_v19, %v579_v18 }
  0xec   : > { %775 = vmatmul.bf16.vlgmr.msrb.gmra.mxu2 %v582_v20 }
  0xf7   : > { %756 = vmatmul.bf16.gmra.mxu3 %v582_v20 }
 0x107   : > { %794 = vmatmul.bf16.vlgmr.msrb.gmra.mxu3 %v582_v20 }
 0x164   : > { %v771_v27 = vpop.f32.mrf.mxu0 }
 0x165   : > { %v790_v24 = vpop.f32.mrf.mxu1 }
 0x166   : > { %v812_v34 = vrot.slane %v790_v24, 1 }
 0x16a   : > { %v752_v21 = vpop.f32.mrf.mxu3 }
 0x16b   : > { %v800_v29 = vrot.slane %v752_v21, 7 }
 0x16c   : > { %v773_v44 = vpop.f32.mrf.mxu0 }
 0x16d   : > { %v792_v26 = vpop.f32.mrf.mxu1 }
 0x16e   : > { %v813_v31 = vrot.slane %v792_v26, 1 }
 0x16f   : > { %v776_v39 = vpop.f32.mrf.mxu2 }
 0x170   : > { %v818_v38 = vsel %vm530_vm1, %v812_v34, %v813_v31 }
 0x172   : > { %v754_v22 = vpop.f32.mrf.mxu3 }
 0x173   : > { %v801_v35 = vrot.slane %v754_v22, 7 }
 0x175   : > { %v806_v40 = vsel %vm517_vm0, %v800_v29, %v801_v35 }
 0x176   : > { %v809_v47 = vadd.f32 %v806_v40, %v773_v44 }
 0x177   : > { %v778_v60 = vpop.f32.mrf.mxu2 }
 0x17a   : > { %v757_v25 = vpop.f32.mrf.mxu3 }
 0x17b   : > { %v802_v48 = vrot.slane %v757_v25, 7 }
 0x17d   : > { %v805_v55 = vsel %vm517_vm0, %v801_v35, %v802_v48 }
 0x17e   : > { %v810_v62 = vadd.f32 %v805_v55, %v776_v39 }
 0x182   : > { %v759_v28 = vpop.f32.mrf.mxu3 }
 0x183   : > { %v803_v33 = vrot.slane %v759_v28, 7 }
 0x185   : > { %v807_v36 = vsel %vm517_vm0, %v803_v33, %v800_v29  ;;  %v804_v56 = vsel %vm517_vm0, %v802_v48, %v803_v33 }
 0x186   : > { %v808_v23 = vadd.f32 %v807_v36, %v771_v27  ;;  %v811_v63 = vadd.f32 %v804_v56, %v778_v60 }
 0x188   : > { %v820_v32 = vadd.f32 %v818_v38, %v808_v23 }
 0x18a   : > { %v825_v42 = vmul.f32 %v1338_v37, %v820_v32  ;;  %v795_v43 = vpop.f32.mrf.mxu3 }
 0x18b   : > { %v814_v46 = vrot.slane %v795_v43, 1 }
 0x18c   : > { %v830_v50 = vadd.f32 %v1339_v41, %v825_v42 }
 0x18d   : > { %v817_v49 = vsel %vm530_vm1, %v813_v31, %v814_v46 }
 0x18e   : > { %v821_v52 = vadd.f32 %v817_v49, %v809_v47  ;;  %v838_v57 = vadd.f32 %v834_v51, %v830_v50 }
 0x190   : > { %v826_v53 = vmul.f32 %v1338_v37, %v821_v52  ;;  %v842_v4 = vmax.f32 %v838_v57, 0.0 }
 0x192   : > { %v831_v58 = vadd.f32 %v1339_v41, %v826_v53  ;;  %v797_v59 = vpop.f32.mrf.mxu3 }
 0x193   : > { %v815_v61 = vrot.slane %v797_v59, 1 }
 0x194   : > { %v839_v0 = vadd.f32 %v835_v54, %v831_v58 }
 0x195   : > { %v816_v2 = vsel %vm530_vm1, %v814_v46, %v815_v61  ;;  %v819_v3 = vsel %vm530_vm1, %v815_v61, %v812_v34 }
 0x196   : > { %v843_v5 = vmax.f32 %v839_v0, 0.0  ;;  %v822_v6 = vadd.f32 %v816_v2, %v810_v62  ;;  %v823_v7 = vadd.f32 %v819_v3, %v811_v63 }
 0x198   : > { %v1235_v9 = vpack.c.bf16 %v843_v5, %v842_v4  ;;  %v827_v10 = vmul.f32 %v1338_v37, %v822_v6  ;;  %v828_v11 = vmul.f32 %v1338_v37, %v823_v7 }
 0x19a   : > { %v832_v13 = vadd.f32 %v1339_v41, %v827_v10  ;;  %v833_v14 = vadd.f32 %v1339_v41, %v828_v11  ;;  %1236 = vst [vmem:[%s266_s12] sm:$0xff] %v1235_v9  }
 0x19c   : > { %v840_v30 = vadd.f32 %v836_v8, %v832_v13  ;;  %v841_v15 = vadd.f32 %v837_v12, %v833_v14 }
 0x19e   : > { %v844_v16 = vmax.f32 %v840_v30, 0.0  ;;  %v845_v17 = vmax.f32 %v841_v15, 0.0 }
 0x1a0   : > { %v1240_v18 = vpack.c.bf16 %v845_v17, %v844_v16 }
 0x1a2   : > { %1242 = vst [vmem:[%s266_s12 + $0x8] sm:$0xff] %v1240_v18  }
 0x1a3   : > { %1457 = shalt.err (!%p1454_p8)
}
 0x1a4   : > { %s1508_s7 = smov 64   ;;  %s1509_s9 = smov 4  }
 0x1a5   : > { %1271 = dma.vmem_to_hbm [thread:$0]  (%p1578_p5), %s868_s13, 256, %s870_s14, %s855_s22, %s1508_s7, %s1508_s7, %s1509_s9  }
 0x1a6 PF: > { %p1293_p9 = scmp.ge.s32.totalorder %s1500_s21, 2  ;;  %s884_s30 = sand.u32 1, %s1488_s18  }
 0x1a7   : > { %s885_s8 = scalar_lea.sflag [#allocation4], %s884_s30 }
 0x1a8   : > { %p1284_p10 = pnand %p1293_p9, %p1582_p6 }
 0x1aa   : > { %p1285_p11 = pneg %p1284_p10 }
 0x1ac   : > { %1483 = dma.done.wait (%p1285_p11), %s885_s8, 256  }
 0x1ad   : > { %1485 = vsyncadd (%p1285_p11), %s885_s8, 4294967040  ;;  %p17_p12 = scmp.ge.s32.totalorder %s1565_s24, 4   ;;  %s1771_s18 = smov %s1492_s19 }
 0x1ae   : > { %s1772_s19 = smov %s1496_s20  ;;  %s1773_s20 = smov %s1576_s27 }
 0x1af   : > { %s1774_s21 = smov %s1565_s24  ;;  %19 = sbr.rel (!%p17_p12) target bundleno = 5 (0x5), region = 88 }
 0x1b4   :  { %891 = vsyncpa [#allocation3], 1 }
 0x1b5   :  { %893 = vsyncpa [#allocation3 + $0x1], 1 }
 0x1b6   :  { %894 = vsyncpa [#allocation6], 1 }
 0x1b7   :  { %895 = vsyncpa [#allocation4], 1 }
 0x1b8   :  { %897 = vsyncpa [#allocation4 + $0x1], 1 }

</bundles_post_ra>
